<compile_context>
chip_gen: v6e
topology: v6e:2x2x1
jax: 0.10.0
libtpu: 0.0.40
codegen_flags: <defaults>
</compile_context>

<pallas_src>
import functools

import jax
import jax.numpy as jnp
from jax.experimental import pallas as pl
from jax.experimental.pallas import tpu as pltpu


def _mlp_kernel(x_ref, w1_ref, b1_ref, w2_ref, b2_ref, w3_ref, b3_ref, o_ref):
    # Hidden layer 1: tanh(x @ W1 + b1)   (bf16 MXU inputs, f32 accumulate)
    h1 = jnp.tanh(
        jnp.dot(x_ref[...], w1_ref[...], preferred_element_type=jnp.float32)
        + b1_ref[...]
    )
    # Hidden layer 2: tanh(h1 @ W2 + b2)
    h2 = jnp.tanh(
        jnp.dot(h1.astype(jnp.bfloat16), w2_ref[...],
                preferred_element_type=jnp.float32)
        + b2_ref[...]
    )
    # Output layer (no activation, lane-padded to 128 cols): h2 @ W3 + b3
    out = (
        jnp.dot(h2.astype(jnp.bfloat16), w3_ref[...],
                preferred_element_type=jnp.float32)
        + b3_ref[...]
    )
    o_ref[...] = out.astype(o_ref.dtype)


@functools.partial(jax.jit, static_argnames=("tile_b",))
def mlp_forward(x, w1, b1, w2, b2, w3, b3, *, tile_b=128):
    """3-layer MLP forward in a single batch-gridded Pallas call.

    Weights are held resident in VMEM across batch tiles (constant index_maps);
    the 51-wide output is zero-padded to 128 lanes inside the call and sliced
    back in the wrapper.
    """
    B, IN = x.shape
    H = w1.shape[1]
    OUT = w3.shape[1]
    OUT_PAD = 128  # lane-dense output width (>= OUT, multiple of 128)

    # Zero-pad the output layer so the last matmul / store is lane-dense.
    w3p = jnp.zeros((H, OUT_PAD), w3.dtype).at[:, :OUT].set(w3)
    b3p = jnp.zeros((1, OUT_PAD), b3.dtype).at[:, :OUT].set(b3)

    # Batch tile: a full MXU M when the batch is big enough, otherwise the
    # whole (sublane-padded) batch.  Pad B up to a multiple of the tile.
    tb = tile_b if B >= tile_b else max(8, ((B + 7) // 8) * 8)
    b_pad = pl.cdiv(B, tb) * tb
    if b_pad != B:
        x = jnp.pad(x, ((0, b_pad - B), (0, 0)))

    # bf16 for MXU operands; biases / accumulation / tanh stay f32.
    xb = x.astype(jnp.bfloat16)
    w1b = w1.astype(jnp.bfloat16)
    w2b = w2.astype(jnp.bfloat16)
    w3b = w3p.astype(jnp.bfloat16)

    const = lambda i: (0, 0)  # weights/biases: same block every grid step
    out = pl.pallas_call(
        _mlp_kernel,
        out_shape=jax.ShapeDtypeStruct((b_pad, OUT_PAD), jnp.float32),
        grid=(b_pad // tb,),
        in_specs=[
            pl.BlockSpec((tb, IN), lambda i: (i, 0)),   # x tile walks the batch
            pl.BlockSpec((IN, H), const),               # W1 (VMEM-resident)
            pl.BlockSpec((1, H), const),                # b1
            pl.BlockSpec((H, H), const),                # W2
            pl.BlockSpec((1, H), const),                # b2
            pl.BlockSpec((H, OUT_PAD), const),          # W3 (padded)
            pl.BlockSpec((1, OUT_PAD), const),          # b3 (padded)
        ],
        out_specs=pl.BlockSpec((tb, OUT_PAD), lambda i: (i, 0)),
        compiler_params=pltpu.CompilerParams(
            dimension_semantics=("parallel",),  # batch tiles are independent
        ),
    )(xb, w1b, b1, w2b, b2, w3b, b3p)

    return out[:B, :OUT]


def xavier_normal(key, fan_in, fan_out):
    # Matches nn.init.xavier_normal_: std = sqrt(2 / (fan_in + fan_out)).
    # Stored as [in, out] (transpose of PyTorch's [out, in]); the distribution
    # is symmetric so the statistics are identical.
    std = (2.0 / (fan_in + fan_out)) ** 0.5
    return std * jax.random.normal(key, (fan_in, fan_out), dtype=jnp.float32)


def reference_forward_f32(x, w1, b1, w2, b2, w3, b3):
    h1 = jnp.tanh(x @ w1 + b1)
    h2 = jnp.tanh(h1 @ w2 + b2)
    return h2 @ w3 + b3


def reference_forward_bf16(x, w1, b1, w2, b2, w3, b3):
    # Same bf16-operand / f32-accumulate recipe as the kernel.
    f32 = jnp.float32
    bf = jnp.bfloat16
    h1 = jnp.tanh(jnp.dot(x.astype(bf), w1.astype(bf),
                          preferred_element_type=f32) + b1)
    h2 = jnp.tanh(jnp.dot(h1.astype(bf), w2.astype(bf),
                          preferred_element_type=f32) + b2)
    return jnp.dot(h2.astype(bf), w3.astype(bf),
                   preferred_element_type=f32) + b3


if __name__ == "__main__":
    key = jax.random.PRNGKey(0)
    k_x, k_x2, k1, k2, k3 = jax.random.split(key, 5)

    IN, H, OUT = 512, 256, 51

    w1 = xavier_normal(k1, IN, H)
    b1 = jnp.zeros((1, H), dtype=jnp.float32)
    w2 = xavier_normal(k2, H, H)
    b2 = jnp.zeros((1, H), dtype=jnp.float32)
    w3 = xavier_normal(k3, H, OUT)
    b3 = jnp.zeros((1, OUT), dtype=jnp.float32)

    # Case 1: small batch (single grid step, sublane-padded batch tile).
    B1 = 8
    x1 = jax.random.normal(k_x, (B1, IN), dtype=jnp.float32)
    out1 = jax.block_until_ready(mlp_forward(x1, w1, b1, w2, b2, w3, b3))
    assert out1.shape == (B1, OUT), out1.shape
    assert jnp.allclose(out1, reference_forward_bf16(x1, w1, b1, w2, b2, w3, b3),
                        atol=2e-2, rtol=2e-2), "mismatch vs bf16 reference (B=8)"
    assert jnp.allclose(out1, reference_forward_f32(x1, w1, b1, w2, b2, w3, b3),
                        atol=6e-2, rtol=6e-2), "mismatch vs f32 reference (B=8)"

    # Case 2: batch that exercises the grid + batch-padding path (3 tiles of 128).
    B2 = 300
    x2 = jax.random.normal(k_x2, (B2, IN), dtype=jnp.float32)
    out2 = jax.block_until_ready(mlp_forward(x2, w1, b1, w2, b2, w3, b3))
    assert out2.shape == (B2, OUT), out2.shape
    assert jnp.allclose(out2, reference_forward_bf16(x2, w1, b1, w2, b2, w3, b3),
                        atol=2e-2, rtol=2e-2), "mismatch vs bf16 reference (B=300)"
    assert jnp.allclose(out2, reference_forward_f32(x2, w1, b1, w2, b2, w3, b3),
                        atol=6e-2, rtol=6e-2), "mismatch vs f32 reference (B=300)"

    print("KERNEL_OK")
</pallas_src>

<mosaic_0001>
module attributes {stable_mosaic.version = 11 : i64} {
  func.func @_mlp_kernel(%arg0: i32, %arg1: memref<8x512xbf16, #tpu.memory_space<vmem>>, %arg2: memref<512x256xbf16, #tpu.memory_space<vmem>>, %arg3: memref<1x256xf32, #tpu.memory_space<vmem>>, %arg4: memref<256x256xbf16, #tpu.memory_space<vmem>>, %arg5: memref<1x256xf32, #tpu.memory_space<vmem>>, %arg6: memref<256x128xbf16, #tpu.memory_space<vmem>>, %arg7: memref<1x128xf32, #tpu.memory_space<vmem>>, %arg8: memref<8x128xf32, #tpu.memory_space<vmem>>) attributes {dimension_semantics = [#tpu.dimension_semantics<parallel>], iteration_bounds = array<i64: 1>, scalar_prefetch = 0 : i64, scratch_operands = 0 : i64, tpu.core_type = #tpu.core_type<tc>, window_params = [{transform_indices = @transform_0, window_bounds = array<i64: 8, 512>}, {pipeline_mode = #tpu.pipeline_mode<synchronous>, transform_indices = @transform_1, window_bounds = array<i64: 512, 256>}, {pipeline_mode = #tpu.pipeline_mode<synchronous>, transform_indices = @transform_2, window_bounds = array<i64: 1, 256>}, {pipeline_mode = #tpu.pipeline_mode<synchronous>, transform_indices = @transform_3, window_bounds = array<i64: 256, 256>}, {pipeline_mode = #tpu.pipeline_mode<synchronous>, transform_indices = @transform_4, window_bounds = array<i64: 1, 256>}, {pipeline_mode = #tpu.pipeline_mode<synchronous>, transform_indices = @transform_5, window_bounds = array<i64: 256, 128>}, {pipeline_mode = #tpu.pipeline_mode<synchronous>, transform_indices = @transform_6, window_bounds = array<i64: 1, 128>}, {transform_indices = @transform_7, window_bounds = array<i64: 8, 128>}]} {
    %c0 = arith.constant 0 : index
    %c0_0 = arith.constant 0 : index
    %0 = vector.load %arg1[%c0, %c0_0] : memref<8x512xbf16, #tpu.memory_space<vmem>>, vector<8x512xbf16>
    %c0_1 = arith.constant 0 : index
    %c0_2 = arith.constant 0 : index
    %1 = vector.load %arg2[%c0_1, %c0_2] : memref<512x256xbf16, #tpu.memory_space<vmem>>, vector<512x256xbf16>
    %cst = arith.constant dense<0.000000e+00> : vector<8x256xf32>
    %2 = tpu.matmul %0, %1, %cst {dimension_numbers = #tpu.dot_dimension_numbers<[1], [0], [0], [1], [0, 0, 1, 1], [], []>} : vector<8x512xbf16>, vector<512x256xbf16>, vector<8x256xf32> -> vector<8x256xf32>
    %c0_3 = arith.constant 0 : index
    %c0_4 = arith.constant 0 : index
    %3 = vector.load %arg3[%c0_3, %c0_4] : memref<1x256xf32, #tpu.memory_space<vmem>>, vector<1x256xf32>
    %4 = vector.broadcast %3 : vector<1x256xf32> to vector<8x256xf32>
    %5 = arith.addf %2, %4 : vector<8x256xf32>
    %6 = math.tanh %5 : vector<8x256xf32>
    %7 = arith.truncf %6 : vector<8x256xf32> to vector<8x256xbf16>
    %c0_5 = arith.constant 0 : index
    %c0_6 = arith.constant 0 : index
    %8 = vector.load %arg4[%c0_5, %c0_6] : memref<256x256xbf16, #tpu.memory_space<vmem>>, vector<256x256xbf16>
    %cst_7 = arith.constant dense<0.000000e+00> : vector<8x256xf32>
    %9 = tpu.matmul %7, %8, %cst_7 {dimension_numbers = #tpu.dot_dimension_numbers<[1], [0], [0], [1], [0, 0, 1, 1], [], []>} : vector<8x256xbf16>, vector<256x256xbf16>, vector<8x256xf32> -> vector<8x256xf32>
    %c0_8 = arith.constant 0 : index
    %c0_9 = arith.constant 0 : index
    %10 = vector.load %arg5[%c0_8, %c0_9] : memref<1x256xf32, #tpu.memory_space<vmem>>, vector<1x256xf32>
    %11 = vector.broadcast %10 : vector<1x256xf32> to vector<8x256xf32>
    %12 = arith.addf %9, %11 : vector<8x256xf32>
    %13 = math.tanh %12 : vector<8x256xf32>
    %14 = arith.truncf %13 : vector<8x256xf32> to vector<8x256xbf16>
    %c0_10 = arith.constant 0 : index
    %c0_11 = arith.constant 0 : index
    %15 = vector.load %arg6[%c0_10, %c0_11] : memref<256x128xbf16, #tpu.memory_space<vmem>>, vector<256x128xbf16>
    %cst_12 = arith.constant dense<0.000000e+00> : vector<8x128xf32>
    %16 = tpu.matmul %14, %15, %cst_12 {dimension_numbers = #tpu.dot_dimension_numbers<[1], [0], [0], [1], [0, 0, 1, 1], [], []>} : vector<8x256xbf16>, vector<256x128xbf16>, vector<8x128xf32> -> vector<8x128xf32>
    %c0_13 = arith.constant 0 : index
    %c0_14 = arith.constant 0 : index
    %17 = vector.load %arg7[%c0_13, %c0_14] : memref<1x128xf32, #tpu.memory_space<vmem>>, vector<1x128xf32>
    %18 = vector.broadcast %17 : vector<1x128xf32> to vector<8x128xf32>
    %19 = arith.addf %16, %18 : vector<8x128xf32>
    %c0_15 = arith.constant 0 : index
    %c0_16 = arith.constant 0 : index
    %20 = vector.load %arg8[%c0_15, %c0_16] : memref<8x128xf32, #tpu.memory_space<vmem>>, vector<8x128xf32>
    tpu.vector_store %arg8[%c0_15, %c0_16], %19 {strides = array<i32>} : memref<8x128xf32, #tpu.memory_space<vmem>>, vector<8x128xf32>,
    return
  }
  func.func @transform_0(%arg0: i32) -> (i32, i32) {
    %c0_i32 = arith.constant 0 : i32
    %c0_i32_0 = arith.constant 0 : i32
    return %arg0, %c0_i32 : i32, i32
  }
  func.func @transform_1(%arg0: i32) -> (i32, i32) {
    %c0_i32 = arith.constant 0 : i32
    %c0_i32_0 = arith.constant 0 : i32
    %c0_i32_1 = arith.constant 0 : i32
    return %c0_i32, %c0_i32_0 : i32, i32
  }
  func.func @transform_2(%arg0: i32) -> (i32, i32) {
    %c0_i32 = arith.constant 0 : i32
    %c0_i32_0 = arith.constant 0 : i32
    %c0_i32_1 = arith.constant 0 : i32
    return %c0_i32, %c0_i32_0 : i32, i32
  }
  func.func @transform_3(%arg0: i32) -> (i32, i32) {
    %c0_i32 = arith.constant 0 : i32
    %c0_i32_0 = arith.constant 0 : i32
    %c0_i32_1 = arith.constant 0 : i32
    return %c0_i32, %c0_i32_0 : i32, i32
  }
  func.func @transform_4(%arg0: i32) -> (i32, i32) {
    %c0_i32 = arith.constant 0 : i32
    %c0_i32_0 = arith.constant 0 : i32
    %c0_i32_1 = arith.constant 0 : i32
    return %c0_i32, %c0_i32_0 : i32, i32
  }
  func.func @transform_5(%arg0: i32) -> (i32, i32) {
    %c0_i32 = arith.constant 0 : i32
    %c0_i32_0 = arith.constant 0 : i32
    %c0_i32_1 = arith.constant 0 : i32
    return %c0_i32, %c0_i32_0 : i32, i32
  }
  func.func @transform_6(%arg0: i32) -> (i32, i32) {
    %c0_i32 = arith.constant 0 : i32
    %c0_i32_0 = arith.constant 0 : i32
    %c0_i32_1 = arith.constant 0 : i32
    return %c0_i32, %c0_i32_0 : i32, i32
  }
  func.func @transform_7(%arg0: i32) -> (i32, i32) {
    %c0_i32 = arith.constant 0 : i32
    %c0_i32_0 = arith.constant 0 : i32
    return %arg0, %c0_i32 : i32, i32
  }
}

</mosaic_0001>

<bundles_post_ra>
// kernel: mlp_forward.1
= control target key start
LH: loop header
LB: loop body
LE: loop exit
PB: predicated region body
PF: predicated region fallthrough
CT: control target
= control target key end

     0   :  { %s1694_s0 = inlined_call_operand.vmem [shape: bf16[8,512], index: 0, kind: input, shape index: {}]   ;;  %s1695_s1 = inlined_call_operand.vmem [shape: bf16[512,256], index: 1, kind: input, shape index: {}]   ;;  %s1696_s2 = inlined_call_operand.vmem [shape: f32[1,256], index: 2, kind: input, shape index: {}]   ;;  %s1697_s3 = inlined_call_operand.vmem [shape: bf16[256,256], index: 3, kind: input, shape index: {}]   ;;  %s1698_s4 = inlined_call_operand.vmem [shape: f32[1,256], index: 4, kind: input, shape index: {}]   ;;  %s1699_s5 = inlined_call_operand.vmem [shape: bf16[256,128], index: 5, kind: input, shape index: {}]   ;;  %s1700_s6 = inlined_call_operand.vmem [shape: f32[1,128], index: 6, kind: input, shape index: {}]   ;;  %s1701_s7 = inlined_call_operand.hbm [shape: f32[8,128], index: 7, kind: output, shape index: {}]  }
   0x1   :  { %v1105_v0 = vld [vmem:[%s1695_s1 + $0x74] ss:$8 sps:$4 sm:$0xff]   ;;  %v1109_v2 = vld [vmem:[%s1695_s1 + $0x70] ss:$8 sps:$4 sm:$0xff]   ;;  %v1111_v4 = vld [vmem:[%s1695_s1 + $0x64] ss:$8 sps:$4 sm:$0xff]  }
   0x2   :  { %v1107_v1 = vld [vmem:[%s1695_s1 + $0x174] ss:$8 sps:$4 sm:$0xff]   ;;  %440 = vmatprep.subr.bf16.mxu0 %v1105_v0  ;;  %v1110_v3 = vld [vmem:[%s1695_s1 + $0x170] ss:$8 sps:$4 sm:$0xff]   ;;  %v1113_v5 = vld [vmem:[%s1695_s1 + $0x164] ss:$8 sps:$4 sm:$0xff]  }
   0x3   :  { %481 = vmatprep.subr.bf16.mxu1 %v1107_v1  ;;  %441 = vmatpush1.bf16.msra.mxu0 %v1109_v2  ;;  %v1115_v6 = vld [vmem:[%s1695_s1 + $0x60] ss:$8 sps:$4 sm:$0xff]   ;;  %v1117_v8 = vld [vmem:[%s1695_s1 + $0x54] ss:$8 sps:$4 sm:$0xff]   ;;  %v1121_v10 = vld [vmem:[%s1695_s1 + $0x50] ss:$8 sps:$4 sm:$0xff]  }
   0x4   :  { %482 = vmatpush1.bf16.msra.mxu1 %v1110_v3  ;;  %442 = vmatprep.subr.bf16.mxu0 %v1111_v4  ;;  %v1116_v7 = vld [vmem:[%s1695_s1 + $0x160] ss:$8 sps:$4 sm:$0xff]   ;;  %v1119_v9 = vld [vmem:[%s1695_s1 + $0x154] ss:$8 sps:$4 sm:$0xff]   ;;  %v1122_v11 = vld [vmem:[%s1695_s1 + $0x150] ss:$8 sps:$4 sm:$0xff]  }
   0x5   :  { %483 = vmatprep.subr.bf16.mxu1 %v1113_v5  ;;  %v1123_v12 = vld [vmem:[%s1695_s1 + $0x44] ss:$8 sps:$4 sm:$0xff]   ;;  %v1127_v14 = vld [vmem:[%s1695_s1 + $0x40] ss:$8 sps:$4 sm:$0xff]   ;;  %v1129_v16 = vld [vmem:[%s1695_s1 + $0x34] ss:$8 sps:$4 sm:$0xff]  }
   0x6   :  { %v1125_v13 = vld [vmem:[%s1695_s1 + $0x144] ss:$8 sps:$4 sm:$0xff]   ;;  %v1128_v15 = vld [vmem:[%s1695_s1 + $0x140] ss:$8 sps:$4 sm:$0xff]   ;;  %v1131_v17 = vld [vmem:[%s1695_s1 + $0x134] ss:$8 sps:$4 sm:$0xff]  }
   0x7   :  { %443 = vmatpush1.bf16.msra.mxu0 %v1115_v6  ;;  %v1133_v18 = vld [vmem:[%s1695_s1 + $0x30] ss:$8 sps:$4 sm:$0xff]   ;;  %v1135_v20 = vld [vmem:[%s1695_s1 + $0x24] ss:$8 sps:$4 sm:$0xff]   ;;  %v1139_v22 = vld [vmem:[%s1695_s1 + $0x20] ss:$8 sps:$4 sm:$0xff]  }
   0x8   :  { %484 = vmatpush1.bf16.msra.mxu1 %v1116_v7  ;;  %444 = vmatprep.subr.bf16.mxu0 %v1117_v8  ;;  %v1134_v19 = vld [vmem:[%s1695_s1 + $0x130] ss:$8 sps:$4 sm:$0xff]   ;;  %v1137_v21 = vld [vmem:[%s1695_s1 + $0x124] ss:$8 sps:$4 sm:$0xff]   ;;  %v1140_v23 = vld [vmem:[%s1695_s1 + $0x120] ss:$8 sps:$4 sm:$0xff]  }
   0x9   :  { %485 = vmatprep.subr.bf16.mxu1 %v1119_v9  ;;  %v1141_v24 = vld [vmem:[%s1695_s1 + $0x14] ss:$8 sps:$4 sm:$0xff]   ;;  %v1145_v26 = vld [vmem:[%s1695_s1 + $0x10] ss:$8 sps:$4 sm:$0xff]   ;;  %v1147_v28 = vld [vmem:[%s1695_s1 + $0x4] ss:$8 sps:$4 sm:$0xff]  }
   0xa   :  { %v1143_v25 = vld [vmem:[%s1695_s1 + $0x114] ss:$8 sps:$4 sm:$0xff]   ;;  %v1146_v27 = vld [vmem:[%s1695_s1 + $0x110] ss:$8 sps:$4 sm:$0xff]   ;;  %v1149_v29 = vld [vmem:[%s1695_s1 + $0x104] ss:$8 sps:$4 sm:$0xff]  }
   0xb   :  { %445 = vmatpush1.bf16.msra.mxu0 %v1121_v10  ;;  %v1151_v30 = vld [vmem:[%s1695_s1] ss:$8 sps:$4 sm:$0xff]   ;;  %v1153_v32 = vld [vmem:[%s1695_s1 + $0xf4] ss:$8 sps:$4 sm:$0xff]   ;;  %v1157_v34 = vld [vmem:[%s1695_s1 + $0xf0] ss:$8 sps:$4 sm:$0xff]  }
   0xc   :  { %486 = vmatpush1.bf16.msra.mxu1 %v1122_v11  ;;  %446 = vmatprep.subr.bf16.mxu0 %v1123_v12  ;;  %v1152_v31 = vld [vmem:[%s1695_s1 + $0x100] ss:$8 sps:$4 sm:$0xff]   ;;  %v1155_v33 = vld [vmem:[%s1695_s1 + $0x1f4] ss:$8 sps:$4 sm:$0xff]   ;;  %v1158_v35 = vld [vmem:[%s1695_s1 + $0x1f0] ss:$8 sps:$4 sm:$0xff]  }
   0xd   :  { %487 = vmatprep.subr.bf16.mxu1 %v1125_v13  ;;  %v1159_v36 = vld [vmem:[%s1695_s1 + $0xe4] ss:$8 sps:$4 sm:$0xff]   ;;  %v1163_v38 = vld [vmem:[%s1695_s1 + $0xe0] ss:$8 sps:$4 sm:$0xff]   ;;  %v1165_v40 = vld [vmem:[%s1695_s1 + $0xd4] ss:$8 sps:$4 sm:$0xff]  }
   0xe   :  { %v1161_v37 = vld [vmem:[%s1695_s1 + $0x1e4] ss:$8 sps:$4 sm:$0xff]   ;;  %v1164_v39 = vld [vmem:[%s1695_s1 + $0x1e0] ss:$8 sps:$4 sm:$0xff]   ;;  %v1167_v41 = vld [vmem:[%s1695_s1 + $0x1d4] ss:$8 sps:$4 sm:$0xff]  }
   0xf   :  { %447 = vmatpush1.bf16.msra.mxu0 %v1127_v14  ;;  %v1169_v42 = vld [vmem:[%s1695_s1 + $0xd0] ss:$8 sps:$4 sm:$0xff]   ;;  %v1171_v44 = vld [vmem:[%s1695_s1 + $0xc4] ss:$8 sps:$4 sm:$0xff]   ;;  %v1175_v49 = vld [vmem:[%s1695_s1 + $0xc0] ss:$8 sps:$4 sm:$0xff]  }
  0x10   :  { %488 = vmatpush1.bf16.msra.mxu1 %v1128_v15  ;;  %448 = vmatprep.subr.bf16.mxu0 %v1129_v16  ;;  %v1170_v43 = vld [vmem:[%s1695_s1 + $0x1d0] ss:$8 sps:$4 sm:$0xff]   ;;  %v1173_v45 = vld [vmem:[%s1695_s1 + $0x1c4] ss:$8 sps:$4 sm:$0xff]   ;;  %v1176_v50 = vld [vmem:[%s1695_s1 + $0x1c0] ss:$8 sps:$4 sm:$0xff]  }
  0x11   :  { %489 = vmatprep.subr.bf16.mxu1 %v1131_v17  ;;  %v28_v46 = vld [vmem:[%s1694_s0] sm:$0xff]  ;;  %v29_v48 = vld [vmem:[%s1694_s0 + $0x8] sm:$0xff]  ;;  %v1177_v52 = vld [vmem:[%s1695_s1 + $0xb4] ss:$8 sps:$4 sm:$0xff]  }
  0x12   :  { %v966_v47 = vcombine.high %v28_v46, %v28_v46  ;;  %v968_v51 = vcombine.high %v29_v48, %v29_v48  ;;  %v1179_v53 = vld [vmem:[%s1695_s1 + $0x1b4] ss:$8 sps:$4 sm:$0xff]   ;;  %v1181_v54 = vld [vmem:[%s1695_s1 + $0xb0] ss:$8 sps:$4 sm:$0xff]   ;;  %v1183_v56 = vld [vmem:[%s1695_s1 + $0xa4] ss:$8 sps:$4 sm:$0xff]   ;;  %v965_v6 = vcombine.low %v28_v46, %v28_v46  ;;  %v967_v7 = vcombine.low %v29_v48, %v29_v48 }
  0x13   :  { %449 = vmatpush1.bf16.msra.mxu0 %v1133_v18  ;;  %v1182_v55 = vld [vmem:[%s1695_s1 + $0x1b0] ss:$8 sps:$4 sm:$0xff]   ;;  %v1185_v57 = vld [vmem:[%s1695_s1 + $0x1a4] ss:$8 sps:$4 sm:$0xff]   ;;  %v1187_v58 = vld [vmem:[%s1695_s1 + $0xa0] ss:$8 sps:$4 sm:$0xff]  }
  0x14   :  { %490 = vmatpush1.bf16.msra.mxu1 %v1134_v19  ;;  %450 = vmatprep.subr.bf16.mxu0 %v1135_v20  ;;  %v1188_v59 = vld [vmem:[%s1695_s1 + $0x1a0] ss:$8 sps:$4 sm:$0xff]   ;;  %v1189_v60 = vld [vmem:[%s1695_s1 + $0x94] ss:$8 sps:$4 sm:$0xff]   ;;  %v1193_v62 = vld [vmem:[%s1695_s1 + $0x90] ss:$8 sps:$4 sm:$0xff]  }
  0x15   :  { %491 = vmatprep.subr.bf16.mxu1 %v1137_v21  ;;  %472 = vmatprep.mubr.bf16.mxu0 %v966_v47  ;;  %v1191_v61 = vld [vmem:[%s1695_s1 + $0x194] ss:$8 sps:$4 sm:$0xff]   ;;  %v1194_v63 = vld [vmem:[%s1695_s1 + $0x190] ss:$8 sps:$4 sm:$0xff]   ;;  %v1195_v0 = vld [vmem:[%s1695_s1 + $0x84] ss:$8 sps:$4 sm:$0xff]  }
  0x16   :  { %513 = vmatprep.mubr.bf16.mxu1 %v968_v51  ;;  %v1197_v1 = vld [vmem:[%s1695_s1 + $0x184] ss:$8 sps:$4 sm:$0xff]   ;;  %v1199_v2 = vld [vmem:[%s1695_s1 + $0x80] ss:$8 sps:$4 sm:$0xff]   ;;  %v1207_v4 = vld [vmem:[%s1697_s3 + $0x74] ss:$8 sps:$4 sm:$0xff]  }
  0x17   :  { %451 = vmatpush1.bf16.msra.mxu0 %v1139_v22  ;;  %v1200_v3 = vld [vmem:[%s1695_s1 + $0x180] ss:$8 sps:$4 sm:$0xff]   ;;  %v1205_v5 = vld [vmem:[%s1697_s3 + $0x70] ss:$8 sps:$4 sm:$0xff]   ;;  %v1210_v8 = vld [vmem:[%s1697_s3 + $0x64] ss:$8 sps:$4 sm:$0xff]  }
  0x18   :  { %492 = vmatpush1.bf16.msra.mxu1 %v1140_v23  ;;  %452 = vmatprep.subr.bf16.mxu0 %v1141_v24  ;;  %v1208_v9 = vld [vmem:[%s1697_s3 + $0x60] ss:$8 sps:$4 sm:$0xff]   ;;  %v1213_v10 = vld [vmem:[%s1697_s3 + $0x54] ss:$8 sps:$4 sm:$0xff]  }
  0x19   :  { %493 = vmatprep.subr.bf16.mxu1 %v1143_v25 }
  0x1b   :  { %453 = vmatpush1.bf16.msra.mxu0 %v1145_v26 }
  0x1c   :  { %494 = vmatpush1.bf16.msra.mxu1 %v1146_v27  ;;  %454 = vmatprep.subr.bf16.mxu0 %v1147_v28 }
  0x1d   :  { %495 = vmatprep.subr.bf16.mxu1 %v1149_v29 }
  0x1f   :  { %455 = vmatpush1.bf16.msra.mxu0 %v1151_v30 }
  0x20   :  { %496 = vmatpush1.bf16.msra.mxu1 %v1152_v31  ;;  %456 = vmatprep.subr.bf16.mxu0 %v1153_v32 }
  0x21   :  { %497 = vmatprep.subr.bf16.mxu1 %v1155_v33 }
  0x23   :  { %457 = vmatpush2.bf16.msra.mxu0 %v1157_v34 }
  0x24   :  { %498 = vmatpush2.bf16.msra.mxu1 %v1158_v35  ;;  %458 = vmatprep.subr.bf16.mxu0 %v1159_v36 }
  0x25   :  { %499 = vmatprep.subr.bf16.mxu1 %v1161_v37 }
  0x27   :  { %459 = vmatpush2.bf16.msra.mxu0 %v1163_v38 }
  0x28   :  { %500 = vmatpush2.bf16.msra.mxu1 %v1164_v39  ;;  %460 = vmatprep.subr.bf16.mxu0 %v1165_v40 }
  0x29   :  { %501 = vmatprep.subr.bf16.mxu1 %v1167_v41 }
  0x2b   :  { %461 = vmatpush2.bf16.msra.mxu0 %v1169_v42 }
  0x2c   :  { %502 = vmatpush2.bf16.msra.mxu1 %v1170_v43  ;;  %462 = vmatprep.subr.bf16.mxu0 %v1171_v44 }
  0x2d   :  { %503 = vmatprep.subr.bf16.mxu1 %v1173_v45 }
  0x2f   :  { %463 = vmatpush2.bf16.msra.mxu0 %v1175_v49 }
  0x30   :  { %504 = vmatpush2.bf16.msra.mxu1 %v1176_v50  ;;  %464 = vmatprep.subr.bf16.mxu0 %v1177_v52 }
  0x31   :  { %505 = vmatprep.subr.bf16.mxu1 %v1179_v53 }
  0x33   :  { %465 = vmatpush2.bf16.msra.mxu0 %v1181_v54 }
  0x34   :  { %506 = vmatpush2.bf16.msra.mxu1 %v1182_v55  ;;  %466 = vmatprep.subr.bf16.mxu0 %v1183_v56 }
  0x35   :  { %507 = vmatprep.subr.bf16.mxu1 %v1185_v57 }
  0x37   :  { %467 = vmatpush2.bf16.msra.mxu0 %v1187_v58 }
  0x38   :  { %508 = vmatpush2.bf16.msra.mxu1 %v1188_v59  ;;  %468 = vmatprep.subr.bf16.mxu0 %v1189_v60 }
  0x39   :  { %509 = vmatprep.subr.bf16.mxu1 %v1191_v61 }
  0x3b   :  { %469 = vmatpush2.bf16.msra.mxu0 %v1193_v62 }
  0x3c   :  { %510 = vmatpush2.bf16.msra.mxu1 %v1194_v63  ;;  %470 = vmatprep.subr.bf16.mxu0 %v1195_v0 }
  0x3d   :  { %511 = vmatprep.subr.bf16.mxu1 %v1197_v1 }
  0x3f   :  { %471 = vmatpush2.bf16.msra.mxu0 %v1199_v2 }
  0x40   :  { %512 = vmatpush2.bf16.msra.mxu1 %v1200_v3  ;;  %730 = vmatprep.subr.bf16.mxu0 %v1207_v4 }
  0x42   :  { %473 = vmatmul.mubr.bf16.vlgmr.msra.gmra.mxu0 %v965_v6 }
  0x43   :  { %514 = vmatmul.mubr.bf16.vlgmr.msra.gmra.mxu1 %v967_v7  ;;  %731 = vmatpush1.bf16.msra.mxu0 %v1205_v5 }
  0x44   :  { %732 = vmatprep.subr.bf16.mxu0 %v1210_v8 }
  0x45   :  { %12 = vsyncpa [#allocation3], 0  ;;  %v1211_v11 = vld [vmem:[%s1697_s3 + $0x50] ss:$8 sps:$4 sm:$0xff]   ;;  %v1216_v12 = vld [vmem:[%s1697_s3 + $0x44] ss:$8 sps:$4 sm:$0xff]   ;;  %v96_v44 = vlaneseq }
  0x46   :  { %v1214_v13 = vld [vmem:[%s1697_s3 + $0x40] ss:$8 sps:$4 sm:$0xff]   ;;  %v1219_v14 = vld [vmem:[%s1697_s3 + $0x34] ss:$8 sps:$4 sm:$0xff]   ;;  %v1217_v15 = vld [vmem:[%s1697_s3 + $0x30] ss:$8 sps:$4 sm:$0xff]  }
  0x47   :  { %733 = vmatpush1.bf16.msra.mxu0 %v1208_v9  ;;  %v1222_v16 = vld [vmem:[%s1697_s3 + $0x24] ss:$8 sps:$4 sm:$0xff]   ;;  %v1220_v17 = vld [vmem:[%s1697_s3 + $0x20] ss:$8 sps:$4 sm:$0xff]   ;;  %v1225_v18 = vld [vmem:[%s1697_s3 + $0x14] ss:$8 sps:$4 sm:$0xff]  }
  0x48   :  { %734 = vmatprep.subr.bf16.mxu0 %v1213_v10  ;;  %v1223_v19 = vld [vmem:[%s1697_s3 + $0x10] ss:$8 sps:$4 sm:$0xff]   ;;  %v1228_v20 = vld [vmem:[%s1697_s3 + $0x4] ss:$8 sps:$4 sm:$0xff]   ;;  %v1226_v21 = vld [vmem:[%s1697_s3] ss:$8 sps:$4 sm:$0xff]  }
  0x49   :  { %v1231_v22 = vld [vmem:[%s1697_s3 + $0xf4] ss:$8 sps:$4 sm:$0xff]   ;;  %v1229_v23 = vld [vmem:[%s1697_s3 + $0xf0] ss:$8 sps:$4 sm:$0xff]   ;;  %v1234_v24 = vld [vmem:[%s1697_s3 + $0xe4] ss:$8 sps:$4 sm:$0xff]  }
  0x4a   :  { %v1232_v25 = vld [vmem:[%s1697_s3 + $0xe0] ss:$8 sps:$4 sm:$0xff]   ;;  %v1237_v26 = vld [vmem:[%s1697_s3 + $0xd4] ss:$8 sps:$4 sm:$0xff]   ;;  %v1235_v27 = vld [vmem:[%s1697_s3 + $0xd0] ss:$8 sps:$4 sm:$0xff]  }
  0x4b   :  { %735 = vmatpush1.bf16.msra.mxu0 %v1211_v11  ;;  %v1240_v28 = vld [vmem:[%s1697_s3 + $0xc4] ss:$8 sps:$4 sm:$0xff]   ;;  %v1238_v29 = vld [vmem:[%s1697_s3 + $0xc0] ss:$8 sps:$4 sm:$0xff]   ;;  %v1243_v30 = vld [vmem:[%s1697_s3 + $0xb4] ss:$8 sps:$4 sm:$0xff]  }
  0x4c   :  { %736 = vmatprep.subr.bf16.mxu0 %v1216_v12  ;;  %v1241_v31 = vld [vmem:[%s1697_s3 + $0xb0] ss:$8 sps:$4 sm:$0xff]   ;;  %v1246_v32 = vld [vmem:[%s1697_s3 + $0xa4] ss:$8 sps:$4 sm:$0xff]   ;;  %v1244_v33 = vld [vmem:[%s1697_s3 + $0xa0] ss:$8 sps:$4 sm:$0xff]  }
  0x4d   :  { %v1249_v34 = vld [vmem:[%s1697_s3 + $0x94] ss:$8 sps:$4 sm:$0xff]   ;;  %v1247_v35 = vld [vmem:[%s1697_s3 + $0x90] ss:$8 sps:$4 sm:$0xff]   ;;  %v1252_v36 = vld [vmem:[%s1697_s3 + $0x84] ss:$8 sps:$4 sm:$0xff]  }
  0x4e   :  { %v1250_v37 = vld [vmem:[%s1697_s3 + $0x80] ss:$8 sps:$4 sm:$0xff]   ;;  %v1253_v38 = vld [vmem:[%s1699_s5 + $0x78] sm:$0xff]   ;;  %v1255_v40 = vld [vmem:[%s1699_s5 + $0x70] sm:$0xff]   ;;  %v97_v45 = vshrl.u32 %v96_v44, 7  ;;  %s1299_s13 = smov [#allocation2]  }
  0x4f   :  { %737 = vmatpush1.bf16.msra.mxu0 %v1214_v13  ;;  %v1254_v39 = vld [vmem:[%s1699_s5 + $0x38] sm:$0xff]   ;;  %1082 = vmatprep.subr.bf16.mxu1 %v1253_v38  ;;  %v1256_v41 = vld [vmem:[%s1699_s5 + $0x30] sm:$0xff]   ;;  %v1257_v42 = vld [vmem:[%s1699_s5 + $0x68] sm:$0xff]   ;;  %s957_s14 = sshll.u32 %s1299_s13, 4  ;;  %s958_s14 = int_to_ptr.vmem [resolvable:$true] %s957_s14 }
  0x50   :  { %738 = vmatprep.subr.bf16.mxu0 %v1219_v14  ;;  %1083 = vmatpush3.bf16.msra.mxu1 %v1254_v39  ;;  %v1258_v43 = vld [vmem:[%s1699_s5 + $0x28] sm:$0xff]   ;;  %v98_v46 = vsub.s32 0, %v97_v45  ;;  %v94_v47 = vld [vmem:[%s1696_s2] sm:$0x3]  ;;  %v102_v48 = vsub.s32 1, %v97_v45  ;;  %v1261_v5 = vld [vmem:[%s1699_s5 + $0x58] sm:$0xff]   ;;  %p1282_p1 = scmp.lt.s32.totalorder %s958_s14, %s958_s14 }
  0x51   :  { %1084 = vmatprep.subr.bf16.mxu1 %v1255_v40  ;;  %v1259_v3 = vld [vmem:[%s1699_s5 + $0x60] sm:$0xff]   ;;  %v1262_v6 = vld [vmem:[%s1699_s5 + $0x18] sm:$0xff]   ;;  %v1263_v7 = vld [vmem:[%s1699_s5 + $0x50] sm:$0xff]   ;;  %s1277_s15 = scalar_lea.vmem %s958_s14, 128 }
  0x52   :  { %v99_v49 = vrot.slane %v94_v47, %v98_v46  ;;  %v103_v50 = vrot.slane %v94_v47, %v102_v48  ;;  %v1260_v4 = vld [vmem:[%s1699_s5 + $0x20] sm:$0xff]   ;;  %v1264_v8 = vld [vmem:[%s1699_s5 + $0x10] sm:$0xff]   ;;  %v1265_v9 = vld [vmem:[%s1699_s5 + $0x48] sm:$0xff]   ;;  %p1278_p0 = scmp.ne.s32.totalorder %s958_s14, %s1277_s15  ;;  %p1283_p2 = scmp.lt.s32.totalorder %s1277_s15, %s1277_s15 }
  0x53   :  { %739 = vmatpush1.bf16.msra.mxu0 %v1217_v15  ;;  %v1266_v10 = vld [vmem:[%s1699_s5 + $0x8] sm:$0xff]   ;;  %v1267_v11 = vld [vmem:[%s1699_s5 + $0x40] sm:$0xff]  }
  0x54   :  { %740 = vmatprep.subr.bf16.mxu0 %v1222_v16  ;;  %1085 = vmatpush3.bf16.msra.mxu1 %v1256_v41  ;;  %v1268_v12 = vld [vmem:[%s1699_s5] sm:$0xff]   ;;  %p1284_p3 = por %p1283_p2, %p1282_p1 }
  0x55   :  { %1086 = vmatprep.subr.bf16.mxu1 %v1257_v42  ;;  %v558_v13 = vld [vmem:[%s1698_s4] sm:$0x3] }
  0x56   :  { %v563_v14 = vrot.slane %v558_v13, %v98_v46  ;;  %v567_v15 = vrot.slane %v558_v13, %v102_v48  ;;  %p1285_p4 = pnand %p1284_p3, %p1278_p0 }
  0x57   :  { %741 = vmatpush1.bf16.msra.mxu0 %v1220_v17 }
  0x58   :  { %742 = vmatprep.subr.bf16.mxu0 %v1225_v18  ;;  %1087 = vmatpush3.bf16.msra.mxu1 %v1258_v43 }
  0x59   :  { %1088 = vmatprep.subr.bf16.mxu1 %v1259_v3 }
  0x5b   :  { %743 = vmatpush1.bf16.msra.mxu0 %v1223_v19 }
  0x5c   :  { %744 = vmatprep.subr.bf16.mxu0 %v1228_v20  ;;  %1089 = vmatpush3.bf16.msra.mxu1 %v1260_v4 }
  0x5d   :  { %1090 = vmatprep.subr.bf16.mxu1 %v1261_v5 }
  0x5f   :  { %745 = vmatpush1.bf16.msra.mxu0 %v1226_v21 }
  0x60   :  { %746 = vmatprep.subr.bf16.mxu0 %v1231_v22  ;;  %1091 = vmatpush3.bf16.msra.mxu1 %v1262_v6 }
  0x61   :  { %1092 = vmatprep.subr.bf16.mxu1 %v1263_v7 }
  0x63   :  { %747 = vmatpush2.bf16.msra.mxu0 %v1229_v23 }
  0x64   :  { %748 = vmatprep.subr.bf16.mxu0 %v1234_v24  ;;  %1093 = vmatpush3.bf16.msra.mxu1 %v1264_v8 }
  0x65   :  { %1094 = vmatprep.subr.bf16.mxu1 %v1265_v9 }
  0x67   :  { %749 = vmatpush2.bf16.msra.mxu0 %v1232_v25 }
  0x68   :  { %750 = vmatprep.subr.bf16.mxu0 %v1237_v26  ;;  %1095 = vmatpush3.bf16.msra.mxu1 %v1266_v10 }
  0x69   :  { %1096 = vmatprep.subr.bf16.mxu1 %v1267_v11 }
  0x6b   :  { %751 = vmatpush2.bf16.msra.mxu0 %v1235_v27 }
  0x6c   :  { %752 = vmatprep.subr.bf16.mxu0 %v1240_v28  ;;  %1097 = vmatpush3.bf16.msra.mxu1 %v1268_v12  ;;  %v1065_v28 = vld [vmem:[%s1700_s6] ss:$0 sm:$0xff] }
  0x6f   :  { %753 = vmatpush2.bf16.msra.mxu0 %v1238_v29 }
  0x70   :  { %754 = vmatprep.subr.bf16.mxu0 %v1243_v30 }
  0x73   :  { %755 = vmatpush2.bf16.msra.mxu0 %v1241_v31 }
  0x74   :  { %756 = vmatprep.subr.bf16.mxu0 %v1246_v32 }
  0x77   :  { %757 = vmatpush2.bf16.msra.mxu0 %v1244_v33 }
  0x78   :  { %758 = vmatprep.subr.bf16.mxu0 %v1249_v34 }
  0x7b   :  { %759 = vmatpush2.bf16.msra.mxu0 %v1247_v35 }
  0x7c   :  { %760 = vmatprep.subr.bf16.mxu0 %v1252_v36 }
  0x7f   :  { %761 = vmatpush2.bf16.msra.mxu0 %v1250_v37 }
 0x102   :  { %v474_v51 = vpop.f32.mrf.mxu0 }
 0x103   :  { %v515_v52 = vpop.f32.mrf.mxu1  ;;  %v475_v53 = vadd.f32 %v474_v51, %v99_v49 }
 0x104   :  { %v476_v54 = vpop.f32.mrf.mxu0 }
 0x105   :  { %v517_v55 = vpop.f32.mrf.mxu1  ;;  %v516_v56 = vadd.f32 %v515_v52, %v475_v53  ;;  %v477_v57 = vadd.f32 %v476_v54, %v103_v50 }
 0x106   :  { %v478_v58 = vpop.f32.mrf.mxu0 }
 0x107   :  { %v519_v59 = vpop.f32.mrf.mxu1  ;;  %v518_v60 = vadd.f32 %v517_v55, %v477_v57  ;;  %1269 = vtanh.f32 %v516_v56 }
 0x108   :  { %v479_v61 = vpop.f32.mrf.mxu0 }
 0x109   :  { %v520_v62 = vpop.f32.mrf.mxu1  ;;  %1271 = vtanh.f32 %v518_v60 }
 0x114   :  { %v1270_v63 = vpop.eup %1269 }
 0x115   :  { %v524_v2 = vpack.c.bf16 %v1270_v63, %v1270_v63 }
 0x116   :  { %v1272_v0 = vpop.eup %1271 }
 0x117   :  { %v525_v1 = vpack.c.bf16 %v1272_v0, %v1272_v0 }
 0x119   :  { %762 = vmatprep.mubr.bf16.mxu0 %v525_v1 }
 0x11a   :  { %763 = vmatmul.mubr.bf16.vlgmr.msra.gmra.mxu0 %v524_v2 }
 0x1da   :  { %v764_v16 = vpop.f32.mrf.mxu0 }
 0x1db   :  { %v765_v17 = vadd.f32 %v764_v16, %v563_v14 }
 0x1dc   :  { %v766_v18 = vpop.f32.mrf.mxu0 }
 0x1dd   :  { %v767_v19 = vadd.f32 %v766_v18, %v567_v15  ;;  %1273 = vtanh.f32 %v765_v17 }
 0x1de   :  { %v768_v20 = vpop.f32.mrf.mxu0 }
 0x1df   :  { %1275 = vtanh.f32 %v767_v19 }
 0x1e0   :  { %v769_v21 = vpop.f32.mrf.mxu0 }
 0x1ea   :  { %v1274_v22 = vpop.eup %1273 }
 0x1eb   :  { %v773_v25 = vpack.c.bf16 %v1274_v22, %v1274_v22 }
 0x1ec   :  { %v1276_v23 = vpop.eup %1275 }
 0x1ed   :  { %v774_v24 = vpack.c.bf16 %v1276_v23, %v1276_v23 }
 0x1ef   :  { %942 = vmatprep.mubr.bf16.mxu1 %v774_v24 }
 0x1f0   :  { %943 = vmatmul.mubr.bf16.vlgmr.msra.gmra.mxu1 %v773_v25 }
 0x2b0   :  { %v1098_v26 = vpop.f32.mrf.mxu1 }
 0x2b2   :  { %v1099_v27 = vpop.f32.mrf.mxu1 }
 0x2b3   :  { %v1100_v29 = vadd.f32 %v1099_v27, %v1098_v26 }
 0x2b4   :  { %v1101_v30 = vpop.f32.mrf.mxu1 }
 0x2b5   :  { %v945_v31 = vadd.f32 %v1100_v29, %v1065_v28 }
 0x2b6   :  { %v1102_v32 = vpop.f32.mrf.mxu1 }
 0x2b7   :  { %950 = vst [vmem:[#allocation2] sm:$0xff] %v945_v31 }
 0x2b8   :  { %1288 = shalt.err (!%p1285_p4)
}
 0x2b9   :  { %960 = dma.vmem_to_hbm [thread:$0]  %s958_s14, 128, %s1701_s7, [#allocation3]  }
 0x2ba   :  { %1297 = dma.done.wait [#allocation3], 128  }
 0x2bb   :  { %1298 = vsyncadd [#allocation3], 4294967168 }
 0x2bc   :  { %964 = vsyncpa [#allocation3], 1 }

</bundles_post_ra>
